<compile_context>
chip_gen: v6e
topology: v6e:2x2x1
jax: 0.10.0
libtpu: 0.0.40
codegen_flags: <defaults>
</compile_context>

<pallas_src>
import jax
import jax.numpy as jnp
from jax.experimental import pallas as pl
from jax.experimental.pallas import tpu as pltpu


def _round_up(x, m):
    return (x + m - 1) // m * m


def _vmem_capacity_bytes():
    """Physical VMEM capacity (per TensorCore); conservative fallback = 64 MiB."""
    try:
        return int(pltpu.get_tpu_info().vmem_capacity_bytes)
    except Exception:
        return 64 * 1024 * 1024


def perceptron_kernel(x_ref, w1_ref, b1_ref, w2_ref, b2_ref, o_ref):
    # Layer 1: bf16 MXU matmul, f32 accumulation.  When x arrives in its
    # native dtype the cast rides the VPU and hides under the MXU.
    xb = x_ref[...].astype(w1_ref.dtype)
    h = jnp.dot(xb, w1_ref[...], preferred_element_type=jnp.float32)
    h = h + b1_ref[...]                           # (TB, H) + (1, H), f32
    # Sigmoid with a single EUP transcendental: sigmoid(h) = 0.5*(tanh(h/2)+1).
    h = 0.5 * (jnp.tanh(0.5 * h) + 1.0)
    # Layer 2: cast activations to bf16 for the MXU, accumulate in f32.
    out = jnp.dot(h.astype(w2_ref.dtype), w2_ref[...],
                  preferred_element_type=jnp.float32)
    out = out + b2_ref[...]                       # (TB, O) + (1, O), f32
    o_ref[...] = out.astype(o_ref.dtype)          # store directly in caller dtype


def prepare_perceptron_params(w1, b1, w2, b2):
    """Pad feature dims to multiples of 128 and cast weights to bf16, ONCE.

    Zero padding is mathematically inert: padded x columns hit zero W1 rows,
    padded hidden lanes (sigmoid(0)=0.5) hit zero W2 rows, padded output
    columns are sliced off after the kernel.
    """
    IN, H = w1.shape
    OUT = w2.shape[1]
    IN_P, H_P, OUT_P = _round_up(IN, 128), _round_up(H, 128), _round_up(OUT, 128)
    w1p = jnp.pad(w1.astype(jnp.bfloat16), ((0, IN_P - IN), (0, H_P - H)))
    b1p = jnp.pad(b1.astype(jnp.float32).reshape(1, H), ((0, 0), (0, H_P - H)))
    w2p = jnp.pad(w2.astype(jnp.bfloat16), ((0, H_P - H), (0, OUT_P - OUT)))
    b2p = jnp.pad(b2.astype(jnp.float32).reshape(1, OUT), ((0, 0), (0, OUT_P - OUT)))
    return {"w1": w1p, "b1": b1p, "w2": w2p, "b2": b2p,
            "in_features": IN, "out_features": OUT}


def perceptron_forward(x, params, *, batch_tile=None):
    """Fused two-layer perceptron forward. x: (B, IN); params from prepare_perceptron_params."""
    B, IN = x.shape
    assert IN == params["in_features"]
    w1p, b1p, w2p, b2p = params["w1"], params["b1"], params["w2"], params["b2"]
    IN_P, H_P = w1p.shape
    OUT_P = w2p.shape[1]
    OUT = params["out_features"]
    out_dtype = x.dtype

    # Per-generation VMEM budget: ~96 MiB on v5e/v6e (128 MiB VMEM), ~48 MiB on v7x (64 MiB).
    vmem_cap = _vmem_capacity_bytes()
    vmem_limit = min(vmem_cap * 3 // 4, 112 * 1024 * 1024)
    if batch_tile is None:
        batch_tile = 1024 if vmem_cap >= (100 << 20) else 512

    # Weights are single-buffered and must stay VMEM-resident.
    weight_bytes = w1p.nbytes + b1p.nbytes + w2p.nbytes + b2p.nbytes
    if weight_bytes > int(vmem_limit * 0.8):
        # TODO(synk): add a K/N-tiled grid with an f32 accumulator for layer
        # sizes whose weights do not fit VMEM-resident (matters on v7x 64 MiB).
        raise ValueError("hidden/output dims too large for VMEM-resident weights")

    # Batch tile: multiple of 8 (sublane), sized so the grid has >= 2 tiles
    # (lets the "parallel" axis shard across v7x's 2 TensorCores).
    TB = min(batch_tile, max(8, _round_up(-(-B // 2), 8)))

    def _tile_bytes(tb):
        x_elt = 2 if IN_P != IN else x.dtype.itemsize      # bf16 when padded
        return (2 * tb * IN_P * x_elt                      # x double buffer
                + 2 * tb * OUT_P * out_dtype.itemsize      # out double buffer
                + tb * H_P * 4 + tb * OUT_P * 4)           # f32 temporaries

    while TB > 8 and weight_bytes + _tile_bytes(TB) > int(vmem_limit * 0.8):
        TB = max(8, _round_up(TB // 2, 8))

    B_P = _round_up(B, TB)
    if B_P // TB < 2:
        B_P = 2 * TB                                       # guarantee >= 2 batch tiles
    grid = B_P // TB

    if (B_P != B) or (IN_P != IN):
        # Single wrapper pass: pad + cast to bf16 together.
        xp = jnp.pad(x.astype(jnp.bfloat16), ((0, B_P - B), (0, IN_P - IN)))
    else:
        xp = x                                             # native dtype; kernel casts

    resident = pl.Buffered(1)   # constant index_map -> second buffer is pure waste

    out_p = pl.pallas_call(
        perceptron_kernel,
        out_shape=jax.ShapeDtypeStruct((B_P, OUT_P), out_dtype),
        grid_spec=pltpu.PrefetchScalarGridSpec(
            num_scalar_prefetch=0,
            grid=(grid,),
            in_specs=[
                pl.BlockSpec((TB, IN_P), lambda i: (i, 0)),                            # x: batch-tiled
                pl.BlockSpec((IN_P, H_P), lambda i: (0, 0), pipeline_mode=resident),   # W1 resident
                pl.BlockSpec((1, H_P), lambda i: (0, 0), pipeline_mode=resident),      # b1 resident
                pl.BlockSpec((H_P, OUT_P), lambda i: (0, 0), pipeline_mode=resident),  # W2 resident
                pl.BlockSpec((1, OUT_P), lambda i: (0, 0), pipeline_mode=resident),    # b2 resident
            ],
            out_specs=pl.BlockSpec((TB, OUT_P), lambda i: (i, 0)),
        ),
        compiler_params=pltpu.CompilerParams(
            dimension_semantics=("parallel",),   # shard batch tiles across v7x's 2 TCs
            vmem_limit_bytes=vmem_limit,
        ),
    )(xp, w1p, b1p, w2p, b2p)

    return out_p[:B, :OUT]


if __name__ == "__main__":
    batch = 8
    in_features = 32
    hidden_features = 64
    out_features = 16

    key = jax.random.PRNGKey(0)
    kx, kw1, kb1, kw2, kb2 = jax.random.split(key, 5)

    x = jax.random.normal(kx, (batch, in_features), dtype=jnp.float32)
    # Deterministic parameter init (mirrors nn.Parameter(t.randn(...)) in the tutorial Linear).
    w1 = jax.random.normal(kw1, (in_features, hidden_features), dtype=jnp.float32)
    b1 = jax.random.normal(kb1, (hidden_features,), dtype=jnp.float32)
    w2 = jax.random.normal(kw2, (hidden_features, out_features), dtype=jnp.float32)
    b2 = jax.random.normal(kb2, (out_features,), dtype=jnp.float32)

    params = prepare_perceptron_params(w1, b1, w2, b2)   # padded/cast once, reused per call
    out = perceptron_forward(x, params)
    jax.block_until_ready(out)

    # Pure-JAX f32 reference; kernel uses bf16 MXU inputs with f32 accumulation,
    # so tolerances are loosened accordingly.
    ref = jax.nn.sigmoid(x @ w1 + b1) @ w2 + b2
    assert out.shape == (batch, out_features)
    assert out.dtype == x.dtype
    assert jnp.allclose(out, ref, atol=1e-1, rtol=5e-2), (
        f"max abs err = {jnp.max(jnp.abs(out - ref))}")

    print("KERNEL_OK")
</pallas_src>

<mosaic_0001>
module attributes {stable_mosaic.version = 11 : i64} {
  func.func @perceptron_kernel(%arg0: i32, %arg1: memref<8x128xbf16, #tpu.memory_space<vmem>>, %arg2: memref<128x128xbf16, #tpu.memory_space<vmem>>, %arg3: memref<1x128xf32, #tpu.memory_space<vmem>>, %arg4: memref<128x128xbf16, #tpu.memory_space<vmem>>, %arg5: memref<1x128xf32, #tpu.memory_space<vmem>>, %arg6: memref<8x128xf32, #tpu.memory_space<vmem>>) attributes {dimension_semantics = [#tpu.dimension_semantics<parallel>], iteration_bounds = array<i64: 2>, scalar_prefetch = 0 : i64, scratch_operands = 0 : i64, tpu.core_type = #tpu.core_type<tc>, window_params = [{transform_indices = @transform_0, window_bounds = array<i64: 8, 128>}, {pipeline_mode = #tpu.pipeline_mode<synchronous>, transform_indices = @transform_1, window_bounds = array<i64: 128, 128>}, {pipeline_mode = #tpu.pipeline_mode<synchronous>, transform_indices = @transform_2, window_bounds = array<i64: 1, 128>}, {pipeline_mode = #tpu.pipeline_mode<synchronous>, transform_indices = @transform_3, window_bounds = array<i64: 128, 128>}, {pipeline_mode = #tpu.pipeline_mode<synchronous>, transform_indices = @transform_4, window_bounds = array<i64: 1, 128>}, {transform_indices = @transform_5, window_bounds = array<i64: 8, 128>}]} {
    %c0 = arith.constant 0 : index
    %c0_0 = arith.constant 0 : index
    %0 = vector.load %arg1[%c0, %c0_0] : memref<8x128xbf16, #tpu.memory_space<vmem>>, vector<8x128xbf16>
    %c0_1 = arith.constant 0 : index
    %c0_2 = arith.constant 0 : index
    %1 = vector.load %arg2[%c0_1, %c0_2] : memref<128x128xbf16, #tpu.memory_space<vmem>>, vector<128x128xbf16>
    %cst = arith.constant dense<0.000000e+00> : vector<8x128xf32>
    %2 = tpu.matmul %0, %1, %cst {dimension_numbers = #tpu.dot_dimension_numbers<[1], [0], [0], [1], [0, 0, 1, 1], [], []>} : vector<8x128xbf16>, vector<128x128xbf16>, vector<8x128xf32> -> vector<8x128xf32>
    %c0_3 = arith.constant 0 : index
    %c0_4 = arith.constant 0 : index
    %3 = vector.load %arg3[%c0_3, %c0_4] : memref<1x128xf32, #tpu.memory_space<vmem>>, vector<1x128xf32>
    %4 = vector.broadcast %3 : vector<1x128xf32> to vector<8x128xf32>
    %5 = arith.addf %2, %4 : vector<8x128xf32>
    %cst_5 = arith.constant 5.000000e-01 : f32
    %6 = vector.broadcast %cst_5 : f32 to vector<8x128xf32>
    %7 = arith.mulf %6, %5 : vector<8x128xf32>
    %8 = math.tanh %7 : vector<8x128xf32>
    %cst_6 = arith.constant 1.000000e+00 : f32
    %9 = vector.broadcast %cst_6 : f32 to vector<8x128xf32>
    %10 = arith.addf %8, %9 : vector<8x128xf32>
    %cst_7 = arith.constant 5.000000e-01 : f32
    %11 = vector.broadcast %cst_7 : f32 to vector<8x128xf32>
    %12 = arith.mulf %11, %10 : vector<8x128xf32>
    %13 = arith.truncf %12 : vector<8x128xf32> to vector<8x128xbf16>
    %c0_8 = arith.constant 0 : index
    %c0_9 = arith.constant 0 : index
    %14 = vector.load %arg4[%c0_8, %c0_9] : memref<128x128xbf16, #tpu.memory_space<vmem>>, vector<128x128xbf16>
    %cst_10 = arith.constant dense<0.000000e+00> : vector<8x128xf32>
    %15 = tpu.matmul %13, %14, %cst_10 {dimension_numbers = #tpu.dot_dimension_numbers<[1], [0], [0], [1], [0, 0, 1, 1], [], []>} : vector<8x128xbf16>, vector<128x128xbf16>, vector<8x128xf32> -> vector<8x128xf32>
    %c0_11 = arith.constant 0 : index
    %c0_12 = arith.constant 0 : index
    %16 = vector.load %arg5[%c0_11, %c0_12] : memref<1x128xf32, #tpu.memory_space<vmem>>, vector<1x128xf32>
    %17 = vector.broadcast %16 : vector<1x128xf32> to vector<8x128xf32>
    %18 = arith.addf %15, %17 : vector<8x128xf32>
    %c0_13 = arith.constant 0 : index
    %c0_14 = arith.constant 0 : index
    %19 = vector.load %arg6[%c0_13, %c0_14] : memref<8x128xf32, #tpu.memory_space<vmem>>, vector<8x128xf32>
    tpu.vector_store %arg6[%c0_13, %c0_14], %18 {strides = array<i32>} : memref<8x128xf32, #tpu.memory_space<vmem>>, vector<8x128xf32>,
    return
  }
  func.func @transform_0(%arg0: i32) -> (i32, i32) {
    %c0_i32 = arith.constant 0 : i32
    %c0_i32_0 = arith.constant 0 : i32
    return %arg0, %c0_i32 : i32, i32
  }
  func.func @transform_1(%arg0: i32) -> (i32, i32) {
    %c0_i32 = arith.constant 0 : i32
    %c0_i32_0 = arith.constant 0 : i32
    %c0_i32_1 = arith.constant 0 : i32
    return %c0_i32, %c0_i32_0 : i32, i32
  }
  func.func @transform_2(%arg0: i32) -> (i32, i32) {
    %c0_i32 = arith.constant 0 : i32
    %c0_i32_0 = arith.constant 0 : i32
    %c0_i32_1 = arith.constant 0 : i32
    return %c0_i32, %c0_i32_0 : i32, i32
  }
  func.func @transform_3(%arg0: i32) -> (i32, i32) {
    %c0_i32 = arith.constant 0 : i32
    %c0_i32_0 = arith.constant 0 : i32
    %c0_i32_1 = arith.constant 0 : i32
    return %c0_i32, %c0_i32_0 : i32, i32
  }
  func.func @transform_4(%arg0: i32) -> (i32, i32) {
    %c0_i32 = arith.constant 0 : i32
    %c0_i32_0 = arith.constant 0 : i32
    %c0_i32_1 = arith.constant 0 : i32
    return %c0_i32, %c0_i32_0 : i32, i32
  }
  func.func @transform_5(%arg0: i32) -> (i32, i32) {
    %c0_i32 = arith.constant 0 : i32
    %c0_i32_0 = arith.constant 0 : i32
    return %arg0, %c0_i32 : i32, i32
  }
}

</mosaic_0001>

<bundles_post_ra>
// kernel: tpu_custom_call.1
= control target key start
LH: loop header
LB: loop body
LE: loop exit
PB: predicated region body
PF: predicated region fallthrough
CT: control target
= control target key end

     0   :  { %10 = vsyncpa [#allocation3], 0  ;;  %s1158_s0 = inlined_call_operand.hbm [shape: bf16[16,128], index: 0, kind: input, shape index: {}]   ;;  %s1159_s1 = inlined_call_operand.hbm [shape: bf16[128,128], index: 1, kind: input, shape index: {}]   ;;  %s1160_s2 = inlined_call_operand.vmem [shape: f32[1,128], index: 2, kind: input, shape index: {}]   ;;  %s1161_s3 = inlined_call_operand.hbm [shape: bf16[128,128], index: 3, kind: input, shape index: {}]   ;;  %s1162_s4 = inlined_call_operand.vmem [shape: f32[1,128], index: 4, kind: input, shape index: {}]   ;;  %s1163_s5 = inlined_call_operand.hbm [shape: f32[16,128], index: 5, kind: output, shape index: {}]  }
   0x1   :  { %12 = vsyncpa [#allocation3 + $0x1], 0 }
   0x2   :  { %13 = vsyncpa [#allocation6], 0 }
   0x3   :  { %14 = vsyncpa [#allocation4], 0 }
   0x4   :  { %16 = vsyncpa [#allocation4 + $0x1], 0  ;;  %s971_s18 = smov 0   ;;  %s973_s19 = smov 0  }
   0x5   :  { %s975_s20 = smov 0   ;;  %s977_s21 = smov 0  }
   0x6 LB: > { %s992_s22 = sadd.s32 4294967295, %s931_s21   ;;  %s602_s23 = sadd.s32 4294967294, %s931_s21   ;;  %s931_s21 = sphi %s977_s21, %s1185_s21   ;;  %s927_s20 = sphi %s975_s20, %s1184_s20   ;;  %s923_s19 = sphi %s973_s19, %s1183_s19   ;;  %s919_s18 = sphi %s971_s18, %s1182_s18  }
   0x7   : > { %p42_p0 = scmp.ne.s32.totalorder %s923_s19, %s919_s18  ;;  %p1164_p1 = scmp.eq.s32.totalorder %s992_s22, 0 }
   0x8   : > { %p156_p3 = scmp.eq.s32.totalorder %s602_s23, 1  ;;  %p603_p5 = scmp.ge.s32.totalorder %s931_s21, 1 }
   0x9   : > { %p1001_p4 = por %p1164_p1, %p42_p0  ;;  %p163_p7 = scmp.lt.s32.totalorder %s931_s21, 3 }
   0xa   : > { %p1006_p6 = por %p156_p3, %p42_p0  ;;  %s933_s27 = smov [#allocation5]  }
   0xb   : > { %s1168_s24 = scalar_select %p1001_p4, 1, 0 }
   0xc   : > { %s1169_s25 = scalar_select %p1006_p6, 1, 0 }
   0xd   : > { %p1011_p8 = pnand %p603_p5, %p163_p7  ;;  %s175_s28 = sshll.u32 %s933_s27, 4  ;;  %s176_s28 = int_to_ptr.vmem [resolvable:$true] %s175_s28 }
   0xe   : > { %s934_s30 = smov [#allocation7]   ;;  %s794_s7 = scalar_lea.vmem %s176_s28, 1024 }
   0xf   : > { %s1170_s26 = scalar_select %p1011_p8, 1, 0 }
  0x10   : > { %p706_p9 = pneg %p1011_p8  ;;  %s191_s6 = sshll.u32 %s934_s30, 4  ;;  %s192_s6 = int_to_ptr.vmem [resolvable:$true] %s191_s6 }
  0x11   : > { %p795_p13 = scmp.ne.s32.totalorder %s176_s28, %s794_s7  ;;  %p802_p5 = scmp.lt.s32.totalorder %s176_s28, %s176_s28 }
  0x12   : > { %p1020_p11 = pnand %p706_p9, %p1164_p1  ;;  %p803_p7 = scmp.lt.s32.totalorder %s794_s7, %s794_s7 }
  0x14   : > { %p785_p12 = pneg %p1020_p11  ;;  %p804_p10 = por %p803_p7, %p802_p5 }
  0x16   : > { %p797_p0 = pnand %p795_p13, %p785_p12 }
  0x18   : > { %p798_p3 = pneg %p797_p0 }
  0x1a   : > { %p805_p9 = pnand %p804_p10, %p798_p3 }
  0x1c   : > { %808 = shalt.err (!%p805_p9)
}
  0x1d   : > { %s935_s8 = smov 64   ;;  %s936_s9 = smov 4  }
  0x1e   : > { %709 = dma.hbm_to_vmem [thread:$0]  (!%p1020_p11), %s1159_s1, 1024, %s176_s28, [#allocation6], %s935_s8, %s935_s8, %s936_s9  }
  0x1f   : > { %s820_s12 = scalar_lea.vmem %s192_s6, 1024  ;;  %p828_p2 = scmp.lt.s32.totalorder %s192_s6, %s192_s6 }
  0x20   : > { %p821_p1 = scmp.ne.s32.totalorder %s192_s6, %s820_s12  ;;  %p829_p6 = scmp.lt.s32.totalorder %s820_s12, %s820_s12 }
  0x22   : > { %p823_p13 = pnand %p821_p1, %p785_p12  ;;  %p830_p5 = por %p829_p6, %p828_p2 }
  0x24   : > { %p824_p0 = pneg %p823_p13 }
  0x26   : > { %p831_p10 = pnand %p830_p5, %p824_p0 }
  0x28   : > { %834 = shalt.err (!%p831_p10)
}
  0x29   : > { %712 = dma.hbm_to_vmem [thread:$0]  (!%p1020_p11), %s1161_s3, 1024, %s192_s6, [#allocation6], %s935_s8, %s935_s8, %s936_s9  }
  0x2a   : > { %s1043_s15 = sadd.s32 1, %s931_s21   ;;  %s29_s16 = sadd.s32 1, %s927_s20 }
  0x2b   : > { %s26_s17 = ssub.s32 %s931_s21, %s1043_s15  ;;  %p36_p1 = scmp.ne.s32.totalorder %s927_s20, %s923_s19 }
  0x2c   : > { %p27_p2 = scmp.eq.s32.totalorder %s26_s17, 0  ;;  %p37_p6 = scmp.eq.s32.totalorder %s931_s21, 0 }
  0x2d   : > { %p1172_p12 = scmp.eq.s32.totalorder %s992_s22, 1  ;;  %p723_p7 = scmp.lt.s32.totalorder %s931_s21, 2 }
  0x2e   : > { %s1059_s27 = scalar_select %p27_p2, %s927_s20, %s29_s16  }
  0x2f   : > { %p1053_p3 = por %p1172_p12, %p36_p1  ;;  %p38_p9 = por %p37_p6, %p36_p1 }
  0x30   : > { %s208_s28 = sand.u32 1, %s927_s20   ;;  %s608_s30 = sshll.u32 %s931_s21, 6 }
  0x31   : > { %s1173_s23 = scalar_select %p1053_p3, 1, 0 }
  0x32   : > { %s607_s29 = sshll.u32 %s208_s28, 2  ;;  %s1066_s8 = scalar_lea.hbm %s1158_s0, %s608_s30 }
  0x33   : > { %s212_s9 = scalar_lea.vmem [#allocation2], %s607_s29  ;;  %p1068_p11 = pnand %p723_p7, %p38_p9 }
  0x34   : > { %s219_s10 = sshll.u32 %s212_s9, 4  ;;  %s209_s12 = scalar_lea.sflag [#allocation3], %s208_s28  ;;  %s220_s10 = int_to_ptr.vmem [resolvable:$true] %s219_s10 }
  0x35   : > { %s835_s13 = scalar_lea.hbm %s1066_s8, 64  ;;  %p837_p0 = pneg %p1068_p11 }
  0x36   : > { %p836_p13 = scmp.ne.s32.totalorder %s1066_s8, %s835_s13  ;;  %s840_s17 = scalar_lea.hbm %s1158_s0, 128 }
  0x37   : > { %p841_p1 = scmp.lt.s32.totalorder %s1066_s8, %s1158_s0  ;;  %p842_p2 = scmp.lt.s32.totalorder %s840_s17, %s835_s13 }
  0x38   : > { %p838_p5 = pnand %p837_p0, %p836_p13 }
  0x39   : > { %p843_p6 = por %p842_p2, %p841_p1 }
  0x3a   : > { %p839_p10 = pneg %p838_p5 }
  0x3c   : > { %p844_p12 = pnand %p843_p6, %p839_p10 }
  0x3e   : > { %847 = shalt.err (!%p844_p12)
}
  0x3f   : > { %s848_s6 = scalar_lea.vmem %s220_s10, 64  ;;  %s937_s28 = smov [#allocation2]  }
  0x40   : > { %p849_p7 = scmp.ne.s32.totalorder %s220_s10, %s848_s6  ;;  %s853_s7 = sshll.u32 %s937_s28, 4  ;;  %s854_s7 = int_to_ptr.vmem [resolvable:$false] %s853_s7 }
  0x41   : > { %s855_s9 = scalar_lea.vmem %s854_s7, 128  ;;  %p856_p13 = scmp.lt.s32.totalorder %s220_s10, %s854_s7 }
  0x42   : > { %p851_p9 = pnand %p849_p7, %p837_p0  ;;  %p857_p5 = scmp.lt.s32.totalorder %s855_s9, %s848_s6 }
  0x44   : > { %p852_p3 = pneg %p851_p9  ;;  %p858_p4 = por %p857_p5, %p856_p13 }
  0x46   : > { %p859_p8 = pnand %p858_p4, %p852_p3 }
  0x48   : > { %862 = shalt.err (!%p859_p8)
}
  0x49   : > { %716 = dma.hbm_to_vmem [thread:$0]  (!%p1068_p11), %s1066_s8, 64, %s220_s10, %s209_s12  }
  0x4a   : > { %p1175_p10 = scmp.ne.s32.totalorder %s1170_s26, 0 }
  0x4b   : > { %s1089_s13 = sand.u32 (!%p1175_p10), 1, %s923_s19   ;;  %p1176_p0 = scmp.ne.s32.totalorder (!%p1175_p10), %s1168_s24, 0 }
  0x4c   : > { %228 = sbr.rel (%p1175_p10) target bundleno = 545 (0x221), region = 40  ;;  %s610_s14 = sshll.u32 (!%p1175_p10), %s1089_s13, 2 }
  0x4d   : > { %s231_s16 = scalar_lea.sflag (!%p1175_p10), [#allocation3], %s1089_s13  ;;  %s1093_s17 = scalar_lea.vmem (!%p1175_p10), [#allocation2], %s610_s14 }
  0x51   : > { %906 = dma.done.wait (%p1176_p0), %s231_s16, 64  }
  0x52   : > { %908 = vsyncadd (%p1176_p0), %s231_s16, 4294967232  ;;  %p1177_p4 = scmp.eq.s32.totalorder %s992_s22, 0 }
  0x54   : > { %910 = dma.done.wait (%p1177_p4), [#allocation6], 2048   ;;  %p1178_p8 = pmov %p1177_p4 }
  0x55   : > { %v938_v0 = vmov 0.0   ;;  %vm939_vm0 = vmmov 0   ;;  %v765_v1 = vld [vmem:[#allocation5 + $0x38] sm:$0xff]   ;;  %v766_v2 = vld [vmem:[#allocation5 + $0x30] sm:$0xff]   ;;  %v767_v3 = vld [vmem:[#allocation5 + $0x28] sm:$0xff]   ;;  %s613_s8 = sshll.u32 %s1089_s13, 3 }
  0x56   : > { %912 = vsyncadd (%p1178_p8), [#allocation6], 4294965248  ;;  %654 = vmatprep.subr.bf16.mxu0 %v938_v0  ;;  %670 = vmatprep.mubr.msk.bf16.mxu0 %vm939_vm0, %v938_v0  ;;  %v773_v4 = vld [vmem:[#allocation7 + $0x38] sm:$0xff]   ;;  %v768_v5 = vld [vmem:[#allocation5 + $0x20] sm:$0xff]   ;;  %s633_s12 = sshll.u32 %s992_s22, 7  ;;  %s268_s30 = scalar_lea.vmem [#allocation8], %s613_s8 }
  0x57   : > { %674 = vmatprep.subr.bf16.mxu1 %v938_v0  ;;  %690 = vmatprep.mubr.msk.bf16.mxu1 %vm939_vm0, %v938_v0  ;;  %v774_v6 = vld [vmem:[#allocation7 + $0x30] sm:$0xff]   ;;  %v769_v7 = vld [vmem:[#allocation5 + $0x18] sm:$0xff]   ;;  %v771_v9 = vld [vmem:[#allocation5 + $0x8] sm:$0xff]   ;;  %s513_s29 = sshll.u32 %s268_s30, 4  ;;  %s1115_s7 = scalar_lea.hbm %s1163_s5, %s633_s12  ;;  %s1117_s29 = int_to_ptr.vmem [resolvable:$true] %s513_s29 }
  0x58   : > { %655 = vmatpush3.bf16.msra.mxu0 %v765_v1  ;;  %675 = vmatpush3.bf16.msra.mxu1 %v773_v4  ;;  %v770_v8 = vld [vmem:[#allocation5 + $0x10] sm:$0xff]   ;;  %v772_v10 = vld [vmem:[#allocation5] sm:$0xff]   ;;  %v270_v11 = vld [vmem:[%s1093_s17] sm:$0xf]  ;;  %s500_s9 = scalar_lea.sflag [#allocation4], %s1089_s13  ;;  %s863_s14 = scalar_lea.vmem %s1117_s29, 128 }
  0x59   : > { %656 = vmatprep.subr.bf16.mxu0 %v938_v0  ;;  %676 = vmatprep.subr.bf16.mxu1 %v938_v0  ;;  %v775_v12 = vld [vmem:[#allocation7 + $0x28] sm:$0xff]   ;;  %v776_v13 = vld [vmem:[#allocation7 + $0x20] sm:$0xff]   ;;  %v777_v14 = vld [vmem:[#allocation7 + $0x18] sm:$0xff]   ;;  %p864_p3 = scmp.ne.s32.totalorder %s1117_s29, %s863_s14  ;;  %p1179_p11 = scmp.ne.s32.totalorder %s1173_s23, 0 }
  0x5a   : > { %v778_v15 = vld [vmem:[#allocation7 + $0x10] sm:$0xff]   ;;  %v779_v16 = vld [vmem:[#allocation7 + $0x8] sm:$0xff]   ;;  %v780_v17 = vld [vmem:[#allocation7] sm:$0xff]   ;;  %s940_s22 = smov [#allocation8]  }
  0x5b   : > { %v614_v18 = vld [vmem:[%s1160_s2] ss:$0 sm:$0xff]  ;;  %p865_p1 = pnand %p864_p3, %p1179_p11  ;;  %s867_s16 = sshll.u32 %s940_s22, 4  ;;  %s868_s16 = int_to_ptr.vmem [resolvable:$false] %s867_s16 }
  0x5c   : > { %657 = vmatpush3.bf16.msra.mxu0 %v766_v2  ;;  %677 = vmatpush3.bf16.msra.mxu1 %v774_v6  ;;  %v623_v29 = vld [vmem:[%s1162_s4] ss:$0 sm:$0xff]  ;;  %s869_s17 = scalar_lea.vmem %s868_s16, 256  ;;  %p870_p6 = scmp.lt.s32.totalorder %s1117_s29, %s868_s16 }
  0x5d   : > { %658 = vmatprep.subr.bf16.mxu0 %v938_v0  ;;  %678 = vmatprep.subr.bf16.mxu1 %v938_v0  ;;  %p866_p2 = pneg %p865_p1  ;;  %p871_p12 = scmp.lt.s32.totalorder %s869_s17, %s863_s14 }
  0x5f   : > { %p872_p7 = por %p871_p12, %p870_p6 }
  0x60   : > { %659 = vmatpush3.bf16.msra.mxu0 %v767_v3  ;;  %679 = vmatpush3.bf16.msra.mxu1 %v775_v12 }
  0x61   : > { %660 = vmatprep.subr.bf16.mxu0 %v938_v0  ;;  %680 = vmatprep.subr.bf16.mxu1 %v938_v0  ;;  %p873_p9 = pnand %p872_p7, %p866_p2 }
  0x64   : > { %661 = vmatpush3.bf16.msra.mxu0 %v768_v5  ;;  %681 = vmatpush3.bf16.msra.mxu1 %v776_v13 }
  0x65   : > { %662 = vmatprep.subr.bf16.mxu0 %v938_v0  ;;  %682 = vmatprep.subr.bf16.mxu1 %v938_v0 }
  0x68   : > { %663 = vmatpush3.bf16.msra.mxu0 %v769_v7  ;;  %683 = vmatpush3.bf16.msra.mxu1 %v777_v14 }
  0x69   : > { %664 = vmatprep.subr.bf16.mxu0 %v938_v0  ;;  %684 = vmatprep.subr.bf16.mxu1 %v938_v0 }
  0x6c   : > { %665 = vmatpush3.bf16.msra.mxu0 %v770_v8  ;;  %685 = vmatpush3.bf16.msra.mxu1 %v778_v15 }
  0x6d   : > { %666 = vmatprep.subr.bf16.mxu0 %v938_v0  ;;  %686 = vmatprep.subr.bf16.mxu1 %v938_v0 }
  0x70   : > { %667 = vmatpush3.bf16.msra.mxu0 %v771_v9  ;;  %687 = vmatpush3.bf16.msra.mxu1 %v779_v16 }
  0x71   : > { %668 = vmatprep.subr.bf16.mxu0 %v938_v0  ;;  %688 = vmatprep.subr.bf16.mxu1 %v938_v0 }
  0x74   : > { %669 = vmatpush3.bf16.msra.mxu0 %v772_v10  ;;  %689 = vmatpush3.bf16.msra.mxu1 %v780_v17 }
  0x77   : > { %671 = vmatmul.mubr.bf16.vlgmr.msra.gmra.mxu0 %v270_v11 }
 0x137   : > { %v376_v19 = vpop.f32.mrf.mxu0 }
 0x138   : > { %v377_v20 = vadd.f32 %v614_v18, %v376_v19 }
 0x139   : > { %v672_v21 = vpop.f32.mrf.mxu0 }
 0x13a   : > { %v382_v22 = vmul.f32 0.5, %v377_v20 }
 0x13b   : > { %v379_v23 = vpop.f32.mrf.mxu0 }
 0x13c   : > { %781 = vtanh.f32 %v382_v22 }
 0x13d   : > { %v673_v24 = vpop.f32.mrf.mxu0 }
 0x149   : > { %v782_v25 = vpop.eup %781 }
 0x14a   : > { %v384_v26 = vadd.f32 1.0, %v782_v25 }
 0x14c   : > { %v385_v27 = vmul.f32 0.5, %v384_v26 }
 0x14e   : > { %v386_v28 = vpack.c.bf16 %v385_v27, %v385_v27 }
 0x150   : > { %691 = vmatmul.mubr.bf16.vlgmr.msra.gmra.mxu1 %v386_v28 }
 0x210   : > { %v492_v30 = vpop.f32.mrf.mxu1 }
 0x211   : > { %v493_v31 = vadd.f32 %v623_v29, %v492_v30 }
 0x212   : > { %v692_v32 = vpop.f32.mrf.mxu1 }
 0x213   : > { %498 = vst [vmem:[%s268_s30] sm:$0xff] %v493_v31 }
 0x214   : > { %v495_v33 = vpop.f32.mrf.mxu1 }
 0x215   : > { %876 = shalt.err (!%p873_p9)
}
 0x216   : > { %s877_s24 = scalar_lea.hbm %s1115_s7, 128  ;;  %s881_s8 = scalar_lea.hbm %s1163_s5, 256 }
 0x217   : > { %p878_p13 = scmp.ne.s32.totalorder %s1115_s7, %s877_s24  ;;  %p882_p0 = scmp.lt.s32.totalorder %s1115_s7, %s1163_s5 }
 0x218   : > { %p883_p4 = scmp.lt.s32.totalorder %s881_s8, %s877_s24 }
 0x219   : > { %p879_p5 = pnand %p878_p13, %p1179_p11 }
 0x21a   : > { %p884_p8 = por %p883_p4, %p882_p0 }
 0x21b   : > { %p880_p10 = pneg %p879_p5 }
 0x21d   : > { %p885_p3 = pnand %p884_p8, %p880_p10 }
 0x21f   : > { %888 = shalt.err (!%p885_p3)
}
 0x220   : > { %704 = dma.vmem_to_hbm [thread:$0]  (%p1179_p11), %s1117_s29, 128, %s1115_s7, %s500_s9   ;;  %v693_v34 = vpop.f32.mrf.mxu1 }
 0x221 PF: > { %s525_s12 = sand.u32 1, %s919_s18   ;;  %p1180_p1 = scmp.ne.s32.totalorder %s1169_s25, 0 }
 0x222   : > { %p1181_p2 = scmp.ge.s32.totalorder %s931_s21, 2  ;;  %s526_s30 = scalar_lea.sflag [#allocation4], %s525_s12 }
 0x224   : > { %p718_p6 = pnand %p1181_p2, %p1180_p1 }
 0x226   : > { %p719_p12 = pneg %p718_p6 }
 0x228   : > { %914 = dma.done.wait (%p719_p12), %s526_s30, 128  }
 0x229   : > { %916 = vsyncadd (%p719_p12), %s526_s30, 4294967168  ;;  %p19_p7 = scmp.ge.s32.totalorder %s1043_s15, 4   ;;  %s1182_s18 = smov %s923_s19 }
 0x22a   : > { %s1183_s19 = smov %s927_s20  ;;  %s1184_s20 = smov %s1059_s27 }
 0x22b   : > { %s1185_s21 = smov %s1043_s15  ;;  %21 = sbr.rel (!%p19_p7) target bundleno = 6 (0x6), region = 93 }
 0x230   :  { %531 = vsyncpa [#allocation3], 1 }
 0x231   :  { %533 = vsyncpa [#allocation3 + $0x1], 1 }
 0x232   :  { %534 = vsyncpa [#allocation6], 1 }
 0x233   :  { %535 = vsyncpa [#allocation4], 1 }
 0x234   :  { %537 = vsyncpa [#allocation4 + $0x1], 1 }

</bundles_post_ra>
